<compile_context>
chip_gen: v6e
topology: v6e:2x2x1
jax: 0.10.0
libtpu: 0.0.40
codegen_flags: <defaults>
</compile_context>

<pallas_src>
import jax
import jax.numpy as jnp
from jax.experimental import pallas as pl
from jax.experimental.pallas import tpu as pltpu

FEED_FORWARD_MULTIPLIER = 4


def _round_up(x, m):
    return ((x + m - 1) // m) * m


def _ffn_kernel(x_ref, w1_ref, b1_ref, w2_ref, b2_ref, o_ref, acc_ref):
    """One (TM, D) row-tile x one TH hidden-chunk step of the fused MLP.

    x_ref : (TM, D)  bf16     w1_ref: (D, TH) bf16     b1_ref: (1, TH) f32
    w2_ref: (TH, D)  bf16     b2_ref: (1, D)  f32
    o_ref : (TM, D)  out dtype (resident across the H axis)
    acc_ref: (TM, D) f32 accumulator scratch
    """
    h_idx = pl.program_id(1)

    @pl.when(h_idx == 0)
    def _init():
        acc_ref[...] = jnp.zeros_like(acc_ref)

    # First matmul chunk on the MXU (bf16 operands, f32 accumulate), bias + ReLU.
    hidden = jnp.dot(x_ref[...], w1_ref[...], preferred_element_type=jnp.float32)
    hidden = jnp.maximum(hidden + b1_ref[...], 0.0)

    # Second matmul chunk: accumulate this H-chunk's contribution to the output.
    acc_ref[...] += jnp.dot(hidden.astype(w2_ref.dtype), w2_ref[...],
                            preferred_element_type=jnp.float32)

    @pl.when(h_idx == pl.num_programs(1) - 1)
    def _finalize():
        o_ref[...] = (acc_ref[...] + b2_ref[...]).astype(o_ref.dtype)


def feed_forward_network(x, w1, b1, w2, b2, *, tm=256, th=512):
    """x: (B, T, D) float32; w1: (D, H); b1: (1, H); w2: (H, D); b2: (1, D)."""
    B, T, D = x.shape
    H = w1.shape[1]
    M = B * T

    # Lane/sublane friendly padded sizes & tiles.
    d_pad = _round_up(D, 128)                 # lane-dense feature dim
    th = min(th, _round_up(H, 128))           # hidden chunk, multiple of 128
    h_pad = _round_up(H, th)                  # th divides h_pad
    tm = min(tm, _round_up(M, 8))             # row tile, multiple of 8 sublanes
    m_pad = _round_up(M, tm)                  # tm divides m_pad

    def pad2(a, rows, cols, dtype):
        a = a.astype(dtype)
        r, c = a.shape
        if (r, c) != (rows, cols):
            a = jnp.pad(a, ((0, rows - r), (0, cols - c)))
        return a

    # bf16 matmul operands (zero-padded => padded rows/cols contribute nothing),
    # f32 biases.
    x_p = pad2(x.reshape(M, D), m_pad, d_pad, jnp.bfloat16)
    w1_p = pad2(w1, d_pad, h_pad, jnp.bfloat16)
    b1_p = pad2(b1, 1, h_pad, jnp.float32)
    w2_p = pad2(w2, h_pad, d_pad, jnp.bfloat16)
    b2_p = pad2(b2, 1, d_pad, jnp.float32)

    grid = (m_pad // tm, h_pad // th)

    cost = pl.CostEstimate(
        flops=4 * M * D * H,            # two matmuls: 2*M*D*H each
        transcendentals=0,
        bytes_accessed=(x_p.size * 2 + w1_p.size * 2 + w2_p.size * 2
                        + b1_p.size * 4 + b2_p.size * 4 + m_pad * d_pad * 4),
    )

    out_p = pl.pallas_call(
        _ffn_kernel,
        out_shape=jax.ShapeDtypeStruct((m_pad, d_pad), x.dtype),
        grid_spec=pltpu.PrefetchScalarGridSpec(
            num_scalar_prefetch=0,
            grid=grid,
            in_specs=[
                pl.BlockSpec((tm, d_pad), lambda i, h: (i, 0)),   # x row tile
                pl.BlockSpec((d_pad, th), lambda i, h: (0, h)),   # W1 chunk
                pl.BlockSpec((1, th),     lambda i, h: (0, h)),   # b1 chunk
                pl.BlockSpec((th, d_pad), lambda i, h: (h, 0)),   # W2 chunk
                pl.BlockSpec((1, d_pad),  lambda i, h: (0, 0)),   # b2 (resident)
            ],
            out_specs=pl.BlockSpec((tm, d_pad), lambda i, h: (i, 0)),
            scratch_shapes=[pltpu.VMEM((tm, d_pad), jnp.float32)],
        ),
        compiler_params=pltpu.CompilerParams(
            dimension_semantics=("parallel", "arbitrary")),
        cost_estimate=cost,
    )(x_p, w1_p, b1_p, w2_p, b2_p)

    return out_p[:M, :D].reshape(B, T, D)


def init_params(key, in_features):
    """Deterministic init mimicking nn.Linear's uniform(-1/sqrt(fan_in), +...)."""
    hidden = in_features * FEED_FORWARD_MULTIPLIER
    k1, k2, k3, k4 = jax.random.split(key, 4)
    bound1 = 1.0 / jnp.sqrt(in_features)
    bound2 = 1.0 / jnp.sqrt(hidden)
    # Stored transposed vs. PyTorch (so kernel does x @ W), same math.
    w1 = jax.random.uniform(k1, (in_features, hidden), jnp.float32, -bound1, bound1)
    b1 = jax.random.uniform(k2, (1, hidden), jnp.float32, -bound1, bound1)
    w2 = jax.random.uniform(k3, (hidden, in_features), jnp.float32, -bound2, bound2)
    b2 = jax.random.uniform(k4, (1, in_features), jnp.float32, -bound2, bound2)
    return w1, b1, w2, b2


if __name__ == "__main__":
    key = jax.random.PRNGKey(0)
    B, T, D = 2, 8, 32
    kx, kp = jax.random.split(key)
    x = jax.random.normal(kx, (B, T, D), jnp.float32)
    w1, b1, w2, b2 = init_params(kp, D)

    out = feed_forward_network(x, w1, b1, w2, b2)
    out = jax.block_until_ready(out)

    # Reference check in plain JAX (eval-mode dropout == identity).
    # bf16 matmul operands => loosen tolerance vs. the f32 reference.
    ref = jnp.maximum(x.reshape(-1, D) @ w1 + b1, 0.0) @ w2 + b2
    ref = ref.reshape(B, T, D)
    assert out.shape == (B, T, D)
    assert jnp.allclose(out, ref, atol=2e-2, rtol=2e-2), (
        float(jnp.max(jnp.abs(out - ref))))

    print("KERNEL_OK")
</pallas_src>

<mosaic_0001>
module attributes {stable_mosaic.version = 11 : i64} {
  func.func @_ffn_kernel(%arg0: i32, %arg1: i32, %arg2: memref<16x128xbf16, #tpu.memory_space<vmem>>, %arg3: memref<128x128xbf16, #tpu.memory_space<vmem>>, %arg4: memref<1x128xf32, #tpu.memory_space<vmem>>, %arg5: memref<128x128xbf16, #tpu.memory_space<vmem>>, %arg6: memref<1x128xf32, #tpu.memory_space<vmem>>, %arg7: memref<16x128xf32, #tpu.memory_space<vmem>>, %arg8: memref<16x128xf32, #tpu.memory_space<vmem>>) attributes {dimension_semantics = [#tpu.dimension_semantics<parallel>, #tpu.dimension_semantics<arbitrary>], iteration_bounds = array<i64: 1, 1>, scalar_prefetch = 0 : i64, scratch_operands = 1 : i64, tpu.core_type = #tpu.core_type<tc>, window_params = [{transform_indices = @transform_0, window_bounds = array<i64: 16, 128>}, {transform_indices = @transform_1, window_bounds = array<i64: 128, 128>}, {transform_indices = @transform_2, window_bounds = array<i64: 1, 128>}, {transform_indices = @transform_3, window_bounds = array<i64: 128, 128>}, {pipeline_mode = #tpu.pipeline_mode<synchronous>, transform_indices = @transform_4, window_bounds = array<i64: 1, 128>}, {transform_indices = @transform_5, window_bounds = array<i64: 16, 128>}]} {
    %c0_i32 = arith.constant 0 : i32
    %0 = arith.cmpi eq, %arg1, %c0_i32 : i32
    %1 = arith.extui %0 : i1 to i32
    %c0_i32_0 = arith.constant 0 : i32
    %2 = arith.cmpi ne, %1, %c0_i32_0 : i32
    scf.if %2 {
      %cst_16 = arith.constant 0.000000e+00 : f32
      %20 = vector.broadcast %cst_16 : f32 to vector<16x128xf32>
      %c0_17 = arith.constant 0 : index
      %c0_18 = arith.constant 0 : index
      %21 = vector.load %arg8[%c0_17, %c0_18] : memref<16x128xf32, #tpu.memory_space<vmem>>, vector<16x128xf32>
      tpu.vector_store %arg8[%c0_17, %c0_18], %20 {strides = array<i32>} : memref<16x128xf32, #tpu.memory_space<vmem>>, vector<16x128xf32>,
    } else {
    }
    %c0 = arith.constant 0 : index
    %c0_1 = arith.constant 0 : index
    %3 = vector.load %arg2[%c0, %c0_1] : memref<16x128xbf16, #tpu.memory_space<vmem>>, vector<16x128xbf16>
    %c0_2 = arith.constant 0 : index
    %c0_3 = arith.constant 0 : index
    %4 = vector.load %arg3[%c0_2, %c0_3] : memref<128x128xbf16, #tpu.memory_space<vmem>>, vector<128x128xbf16>
    %cst = arith.constant dense<0.000000e+00> : vector<16x128xf32>
    %5 = tpu.matmul %3, %4, %cst {dimension_numbers = #tpu.dot_dimension_numbers<[1], [0], [0], [1], [0, 0, 1, 1], [], []>} : vector<16x128xbf16>, vector<128x128xbf16>, vector<16x128xf32> -> vector<16x128xf32>
    %c0_4 = arith.constant 0 : index
    %c0_5 = arith.constant 0 : index
    %6 = vector.load %arg4[%c0_4, %c0_5] : memref<1x128xf32, #tpu.memory_space<vmem>>, vector<1x128xf32>
    %7 = vector.broadcast %6 : vector<1x128xf32> to vector<16x128xf32>
    %8 = arith.addf %5, %7 : vector<16x128xf32>
    %cst_6 = arith.constant 0.000000e+00 : f32
    %9 = vector.broadcast %cst_6 : f32 to vector<16x128xf32>
    %10 = arith.maximumf %8, %9 : vector<16x128xf32>
    %c0_7 = arith.constant 0 : index
    %c0_8 = arith.constant 0 : index
    %11 = vector.load %arg8[%c0_7, %c0_8] : memref<16x128xf32, #tpu.memory_space<vmem>>, vector<16x128xf32>
    %12 = arith.truncf %10 : vector<16x128xf32> to vector<16x128xbf16>
    %c0_9 = arith.constant 0 : index
    %c0_10 = arith.constant 0 : index
    %13 = vector.load %arg5[%c0_9, %c0_10] : memref<128x128xbf16, #tpu.memory_space<vmem>>, vector<128x128xbf16>
    %cst_11 = arith.constant dense<0.000000e+00> : vector<16x128xf32>
    %14 = tpu.matmul %12, %13, %cst_11 {dimension_numbers = #tpu.dot_dimension_numbers<[1], [0], [0], [1], [0, 0, 1, 1], [], []>} : vector<16x128xbf16>, vector<128x128xbf16>, vector<16x128xf32> -> vector<16x128xf32>
    %15 = arith.addf %11, %14 : vector<16x128xf32>
    %c0_12 = arith.constant 0 : index
    %c0_13 = arith.constant 0 : index
    %16 = vector.load %arg8[%c0_12, %c0_13] : memref<16x128xf32, #tpu.memory_space<vmem>>, vector<16x128xf32>
    tpu.vector_store %arg8[%c0_12, %c0_13], %15 {strides = array<i32>} : memref<16x128xf32, #tpu.memory_space<vmem>>, vector<16x128xf32>,
    %c0_i32_14 = arith.constant 0 : i32
    %17 = arith.cmpi eq, %arg1, %c0_i32_14 : i32
    %18 = arith.extui %17 : i1 to i32
    %c0_i32_15 = arith.constant 0 : i32
    %19 = arith.cmpi ne, %18, %c0_i32_15 : i32
    scf.if %19 {
      %c0_16 = arith.constant 0 : index
      %c0_17 = arith.constant 0 : index
      %20 = vector.load %arg8[%c0_16, %c0_17] : memref<16x128xf32, #tpu.memory_space<vmem>>, vector<16x128xf32>
      %c0_18 = arith.constant 0 : index
      %c0_19 = arith.constant 0 : index
      %21 = vector.load %arg6[%c0_18, %c0_19] : memref<1x128xf32, #tpu.memory_space<vmem>>, vector<1x128xf32>
      %22 = vector.broadcast %21 : vector<1x128xf32> to vector<16x128xf32>
      %23 = arith.addf %20, %22 : vector<16x128xf32>
      %c0_20 = arith.constant 0 : index
      %c0_21 = arith.constant 0 : index
      %24 = vector.load %arg7[%c0_20, %c0_21] : memref<16x128xf32, #tpu.memory_space<vmem>>, vector<16x128xf32>
      tpu.vector_store %arg7[%c0_20, %c0_21], %23 {strides = array<i32>} : memref<16x128xf32, #tpu.memory_space<vmem>>, vector<16x128xf32>,
    } else {
    }
    return
  }
  func.func @transform_0(%arg0: i32, %arg1: i32) -> (i32, i32) {
    %c0_i32 = arith.constant 0 : i32
    %c0_i32_0 = arith.constant 0 : i32
    return %arg0, %c0_i32 : i32, i32
  }
  func.func @transform_1(%arg0: i32, %arg1: i32) -> (i32, i32) {
    %c0_i32 = arith.constant 0 : i32
    %c0_i32_0 = arith.constant 0 : i32
    return %c0_i32, %arg1 : i32, i32
  }
  func.func @transform_2(%arg0: i32, %arg1: i32) -> (i32, i32) {
    %c0_i32 = arith.constant 0 : i32
    %c0_i32_0 = arith.constant 0 : i32
    return %c0_i32, %arg1 : i32, i32
  }
  func.func @transform_3(%arg0: i32, %arg1: i32) -> (i32, i32) {
    %c0_i32 = arith.constant 0 : i32
    %c0_i32_0 = arith.constant 0 : i32
    return %arg1, %c0_i32 : i32, i32
  }
  func.func @transform_4(%arg0: i32, %arg1: i32) -> (i32, i32) {
    %c0_i32 = arith.constant 0 : i32
    %c0_i32_0 = arith.constant 0 : i32
    %c0_i32_1 = arith.constant 0 : i32
    return %c0_i32, %c0_i32_0 : i32, i32
  }
  func.func @transform_5(%arg0: i32, %arg1: i32) -> (i32, i32) {
    %c0_i32 = arith.constant 0 : i32
    %c0_i32_0 = arith.constant 0 : i32
    return %arg0, %c0_i32 : i32, i32
  }
}

</mosaic_0001>

<bundles_post_ra>
// kernel: tpu_custom_call.1
= control target key start
LH: loop header
LB: loop body
LE: loop exit
PB: predicated region body
PF: predicated region fallthrough
CT: control target
= control target key end

     0   :  { %10 = vsyncpa [#allocation4], 0  ;;  %s585_s0 = inlined_call_operand.hbm [shape: bf16[16,128], index: 0, kind: input, shape index: {}]   ;;  %s586_s1 = inlined_call_operand.hbm [shape: bf16[128,128], index: 1, kind: input, shape index: {}]   ;;  %s587_s2 = inlined_call_operand.vmem [shape: f32[1,128], index: 2, kind: input, shape index: {}]   ;;  %s588_s3 = inlined_call_operand.hbm [shape: bf16[128,128], index: 3, kind: input, shape index: {}]   ;;  %s589_s4 = inlined_call_operand.vmem [shape: f32[1,128], index: 4, kind: input, shape index: {}]   ;;  %s590_s5 = inlined_call_operand.hbm [shape: f32[16,128], index: 5, kind: output, shape index: {}]  }
   0x1   :  { %11 = vsyncpa [#allocation7], 0 }
   0x2   :  { %12 = vsyncpa [#allocation5], 0  ;;  %s527_s18 = smov [#allocation6]   ;;  %s528_s20 = smov [#allocation3]  }
   0x3   :  { %s30_s19 = sshll.u32 %s527_s18, 4  ;;  %s18_s21 = sshll.u32 %s528_s20, 4  ;;  %s31_s19 = int_to_ptr.vmem [resolvable:$true] %s30_s19  ;;  %s19_s21 = int_to_ptr.vmem [resolvable:$true] %s18_s21 }
   0x4   :  { %s449_s22 = scalar_lea.vmem %s31_s19, 1024  ;;  %p454_p1 = scmp.lt.s32.totalorder %s31_s19, %s31_s19 }
   0x5   :  { %p450_p0 = scmp.ne.s32.totalorder %s31_s19, %s449_s22  ;;  %p455_p2 = scmp.lt.s32.totalorder %s449_s22, %s449_s22 }
   0x7   :  { %p456_p3 = por %p455_p2, %p454_p1 }
   0x9   :  { %p457_p4 = pnand %p456_p3, %p450_p0 }
   0xb   :  { %460 = shalt.err (!%p457_p4)
}
   0xc   :  { %s529_s23 = smov 64   ;;  %s530_s24 = smov 4  }
   0xd   :  { %36 = dma.hbm_to_vmem [thread:$0]  %s586_s1, 1024, %s31_s19, [#allocation7], %s529_s23, %s529_s23, %s530_s24  }
   0xe   :  { %s469_s27 = scalar_lea.vmem %s19_s21, 128  ;;  %p474_p6 = scmp.lt.s32.totalorder %s19_s21, %s19_s21 }
   0xf   :  { %p470_p5 = scmp.ne.s32.totalorder %s19_s21, %s469_s27  ;;  %p475_p7 = scmp.lt.s32.totalorder %s469_s27, %s469_s27 }
  0x11   :  { %p476_p8 = por %p475_p7, %p474_p6 }
  0x13   :  { %p477_p9 = pnand %p476_p8, %p470_p5 }
  0x15   :  { %480 = shalt.err (!%p477_p9)
}
  0x16   :  { %24 = dma.hbm_to_vmem [thread:$0]  %s585_s0, 128, %s19_s21, [#allocation4], %s529_s23, %s529_s23, %s530_s24  }
  0x17   :  { %s531_s30 = smov [#allocation8]  }
  0x18   :  { %s44_s6 = sshll.u32 %s531_s30, 4  ;;  %s45_s6 = int_to_ptr.vmem [resolvable:$true] %s44_s6 }
  0x19   :  { %s489_s7 = scalar_lea.vmem %s45_s6, 1024  ;;  %p494_p11 = scmp.lt.s32.totalorder %s45_s6, %s45_s6 }
  0x1a   :  { %p490_p10 = scmp.ne.s32.totalorder %s45_s6, %s489_s7  ;;  %p495_p12 = scmp.lt.s32.totalorder %s489_s7, %s489_s7 }
  0x1c   :  { %p496_p13 = por %p495_p12, %p494_p11 }
  0x1e   :  { %p497_p0 = pnand %p496_p13, %p490_p10 }
  0x20   :  { %500 = shalt.err (!%p497_p0)
}
  0x21   :  { %50 = dma.hbm_to_vmem [thread:$0]  %s588_s3, 1024, %s45_s6, [#allocation7], %s529_s23, %s529_s23, %s530_s24  }
  0x22   :  { %521 = dma.done.wait [#allocation4], 128  }
  0x23   :  { %522 = vsyncadd [#allocation4], 4294967168 }
  0x24   :  { %523 = dma.done.wait [#allocation7], 2048  }
  0x25   :  { %524 = vsyncadd [#allocation7], 4294965248  ;;  %v532_v0 = vmov 0.0   ;;  %vm533_vm0 = vmmov 0   ;;  %v424_v1 = vld [vmem:[#allocation6 + $0x38] sm:$0xff]   ;;  %v425_v2 = vld [vmem:[#allocation6 + $0x30] sm:$0xff]  }
  0x26   :  { %374 = vmatprep.subr.bf16.mxu0 %v532_v0  ;;  %390 = vmatprep.mubr.msk.bf16.mxu0 %vm533_vm0, %v532_v0  ;;  %v426_v3 = vld [vmem:[#allocation6 + $0x28] sm:$0xff]   ;;  %v433_v4 = vld [vmem:[#allocation8 + $0x38] sm:$0xff]   ;;  %v427_v5 = vld [vmem:[#allocation6 + $0x20] sm:$0xff]   ;;  %s534_s11 = smov [#allocation9]  }
  0x27   :  { %394 = vmatprep.subr.bf16.mxu1 %v532_v0  ;;  %410 = vmatprep.mubr.msk.bf16.mxu1 %vm533_vm0, %v532_v0  ;;  %v434_v6 = vld [vmem:[#allocation8 + $0x30] sm:$0xff]   ;;  %v428_v7 = vld [vmem:[#allocation6 + $0x18] sm:$0xff]   ;;  %v435_v8 = vld [vmem:[#allocation8 + $0x28] sm:$0xff]   ;;  %s324_s12 = sshll.u32 %s534_s11, 4  ;;  %s325_s12 = int_to_ptr.vmem [resolvable:$true] %s324_s12 }
  0x28   :  { %375 = vmatpush3.bf16.msra.mxu0 %v424_v1  ;;  %395 = vmatpush3.bf16.msra.mxu1 %v433_v4  ;;  %v429_v9 = vld [vmem:[#allocation6 + $0x10] sm:$0xff]   ;;  %v436_v10 = vld [vmem:[#allocation8 + $0x20] sm:$0xff]   ;;  %v430_v11 = vld [vmem:[#allocation6 + $0x8] sm:$0xff]   ;;  %p506_p2 = scmp.lt.s32.totalorder %s325_s12, %s325_s12 }
  0x29   :  { %376 = vmatprep.subr.bf16.mxu0 %v532_v0  ;;  %396 = vmatprep.subr.bf16.mxu1 %v532_v0  ;;  %v437_v12 = vld [vmem:[#allocation8 + $0x18] sm:$0xff]   ;;  %v431_v13 = vld [vmem:[#allocation6] sm:$0xff]   ;;  %v438_v15 = vld [vmem:[#allocation8 + $0x10] sm:$0xff]  }
  0x2a   :  { %v432_v14 = vld [vmem:[#allocation3] sm:$0xff]   ;;  %v439_v16 = vld [vmem:[#allocation8 + $0x8] sm:$0xff]   ;;  %v440_v17 = vld [vmem:[#allocation8] sm:$0xff]  }
  0x2b   :  { %v337_v18 = vld [vmem:[%s587_s2] ss:$0 sm:$0xff]  ;;  %s501_s2 = scalar_lea.vmem %s325_s12, 256 }
  0x2c   :  { %377 = vmatpush3.bf16.msra.mxu0 %v425_v2  ;;  %397 = vmatpush3.bf16.msra.mxu1 %v434_v6  ;;  %v355_v28 = vld [vmem:[%s589_s4] ss:$0 sm:$0xff]  ;;  %p502_p1 = scmp.ne.s32.totalorder %s325_s12, %s501_s2  ;;  %p507_p3 = scmp.lt.s32.totalorder %s501_s2, %s501_s2 }
  0x2d   :  { %378 = vmatprep.subr.bf16.mxu0 %v532_v0  ;;  %398 = vmatprep.subr.bf16.mxu1 %v532_v0 }
  0x2e   :  { %p508_p4 = por %p507_p3, %p506_p2 }
  0x30   :  { %379 = vmatpush3.bf16.msra.mxu0 %v426_v3  ;;  %399 = vmatpush3.bf16.msra.mxu1 %v435_v8  ;;  %p509_p5 = pnand %p508_p4, %p502_p1 }
  0x31   :  { %380 = vmatprep.subr.bf16.mxu0 %v532_v0  ;;  %400 = vmatprep.subr.bf16.mxu1 %v532_v0 }
  0x34   :  { %381 = vmatpush3.bf16.msra.mxu0 %v427_v5  ;;  %401 = vmatpush3.bf16.msra.mxu1 %v436_v10 }
  0x35   :  { %382 = vmatprep.subr.bf16.mxu0 %v532_v0  ;;  %402 = vmatprep.subr.bf16.mxu1 %v532_v0 }
  0x38   :  { %383 = vmatpush3.bf16.msra.mxu0 %v428_v7  ;;  %403 = vmatpush3.bf16.msra.mxu1 %v437_v12 }
  0x39   :  { %384 = vmatprep.subr.bf16.mxu0 %v532_v0  ;;  %404 = vmatprep.subr.bf16.mxu1 %v532_v0 }
  0x3c   :  { %385 = vmatpush3.bf16.msra.mxu0 %v429_v9  ;;  %405 = vmatpush3.bf16.msra.mxu1 %v438_v15 }
  0x3d   :  { %386 = vmatprep.subr.bf16.mxu0 %v532_v0  ;;  %406 = vmatprep.subr.bf16.mxu1 %v532_v0 }
  0x40   :  { %387 = vmatpush3.bf16.msra.mxu0 %v430_v11  ;;  %407 = vmatpush3.bf16.msra.mxu1 %v439_v16 }
  0x41   :  { %388 = vmatprep.subr.bf16.mxu0 %v532_v0  ;;  %408 = vmatprep.subr.bf16.mxu1 %v532_v0 }
  0x44   :  { %389 = vmatpush3.bf16.msra.mxu0 %v431_v13  ;;  %409 = vmatpush3.bf16.msra.mxu1 %v440_v17 }
  0x47   :  { %391 = vmatmul.mubr.bf16.vlgmr.msra.gmra.mxu0 %v432_v14 }
 0x107   :  { %v182_v19 = vpop.f32.mrf.mxu0 }
 0x108   :  { %v183_v21 = vadd.f32 %v337_v18, %v182_v19 }
 0x109   :  { %v392_v20 = vpop.f32.mrf.mxu0 }
 0x10a   :  { %v189_v25 = vmax.f32 %v183_v21, 0.0 }
 0x10b   :  { %v185_v22 = vpop.f32.mrf.mxu0 }
 0x10c   :  { %v186_v23 = vadd.f32 %v337_v18, %v185_v22 }
 0x10d   :  { %v393_v24 = vpop.f32.mrf.mxu0 }
 0x10e   :  { %v190_v26 = vmax.f32 %v186_v23, 0.0 }
 0x110   :  { %v193_v27 = vpack.c.bf16 %v190_v26, %v189_v25 }
 0x112   :  { %411 = vmatmul.mubr.bf16.vlgmr.msra.gmra.mxu1 %v193_v27 }
 0x1d2   :  { %v292_v29 = vpop.f32.mrf.mxu1 }
 0x1d3   :  { %v315_v30 = vadd.f32 %v355_v28, %v292_v29 }
 0x1d4   :  { %v412_v31 = vpop.f32.mrf.mxu1 }
 0x1d5   :  { %317 = vst [vmem:[#allocation9] sm:$0xff] %v315_v30 }
 0x1d6   :  { %v295_v32 = vpop.f32.mrf.mxu1 }
 0x1d7   :  { %v316_v33 = vadd.f32 %v355_v28, %v295_v32 }
 0x1d8   :  { %v413_v34 = vpop.f32.mrf.mxu1 }
 0x1d9   :  { %318 = vst [vmem:[#allocation9 + $0x8] sm:$0xff] %v316_v33 }
 0x1da   :  { %512 = shalt.err (!%p509_p5)
}
 0x1db   :  { %s535_s13 = smov 128   ;;  %s536_s4 = smov 8  }
 0x1dc   :  { %330 = dma.vmem_to_hbm [thread:$0]  %s325_s12, 256, %s590_s5, [#allocation5], %s535_s13, %s535_s13, %s536_s4  }
 0x1dd   :  { %525 = dma.done.wait [#allocation5], 256  }
 0x1de   :  { %526 = vsyncadd [#allocation5], 4294967040 }
 0x1df   :  { %334 = vsyncpa [#allocation4], 1 }
 0x1e0   :  { %335 = vsyncpa [#allocation7], 1 }
 0x1e1   :  { %336 = vsyncpa [#allocation5], 1 }

</bundles_post_ra>
